<compile_context>
chip_gen: v5e
topology: v5e:2x2
jax: 0.10.0
libtpu: 0.0.40
codegen_flags: <defaults>
</compile_context>

<pallas_src>
import functools

import jax
import jax.numpy as jnp
from jax.experimental import pallas as pl
from jax.experimental.pallas import tpu as pltpu

PAD_ID = 1


def _translation_loss_kernel(x_ref, tgt_ref, out_ref, acc_ref, *, n_rows):
    """One (tile_rows, V) block of logits; accumulates per-row -logp[tgt]."""
    c = pl.program_id(0)            # megacore-parallel axis
    i = pl.program_id(1)            # reduction over row tiles (arbitrary)
    inner = pl.num_programs(1)
    tile_rows, vocab = x_ref.shape

    @pl.when(i == 0)
    def _():
        acc_ref[...] = jnp.zeros_like(acc_ref)

    x_raw = x_ref[...]                            # (TM, V) native dtype (f32 / bf16)
    tgt = tgt_ref[...]                            # (TM, 1) int32

    # Row max on the native-dtype block (bf16 packs 2x / vreg); exact, then f32.
    m = jnp.max(x_raw, axis=-1, keepdims=True).astype(jnp.float32)     # (TM, 1)

    # Numerically stable log-sum-exp tail in f32; `shifted` is single-use so it
    # fuses into the exp/sum reduction (no extra (TM,V) f32 temp).
    shifted = x_raw.astype(jnp.float32) - m                            # (TM, V)
    lse = jnp.log(jnp.sum(jnp.exp(shifted), axis=-1, keepdims=True))   # (TM, 1)

    # Fused one-hot gather from the RAW block: x[row, tgt[row]].
    # (1, V) iota broadcast against (TM, 1) targets -> no (TM, V) int temp.
    # TODO(synk): out-of-range (non-PAD) target ids silently contribute m+lse
    # instead of raising like torch scatter_ would.
    lane = jax.lax.broadcasted_iota(jnp.int32, (1, vocab), 1)          # (1, V)
    x_at_tgt = jnp.sum(jnp.where(lane == tgt, x_raw, jnp.zeros_like(x_raw)),
                       axis=-1, keepdims=True).astype(jnp.float32)     # (TM, 1)

    # -log_softmax(x)[row, tgt[row]] = (m + lse) - x[row, tgt[row]]
    row_loss = (m + lse) - x_at_tgt                                    # (TM, 1)

    # Mask PAD rows, rows past the true end (ragged last tile reads garbage),
    # and the duplicated clamped tile on odd tile counts.
    row_iota = jax.lax.broadcasted_iota(jnp.int32, (tile_rows, 1), 0)
    global_row = (c * inner + i) * tile_rows + row_iota
    valid = (global_row < n_rows) & (tgt != PAD_ID)

    acc_ref[...] += jnp.where(valid, row_loss, 0.0)

    @pl.when(i == inner - 1)
    def _():
        total = jnp.sum(acc_ref[...])
        out_ref[...] = jnp.full(out_ref.shape, total, dtype=out_ref.dtype)


def translation_loss(x: jax.Array, target: jax.Array, *,
                     tile_rows: int | None = None,
                     x_block_budget_bytes: int = 16 << 20) -> jax.Array:
    """x: (N, V) float logits (f32 or bf16), target: (N,) int ids. Returns scalar f32."""
    N, V = x.shape
    itemsize = jnp.dtype(x.dtype).itemsize
    row_align = 8 if itemsize >= 4 else 16   # bf16 sublane packing wants multiples of 16

    # Chip-aware VMEM capacity (v5e/v6e: 128 MiB, v7x: 64 MiB per TC).
    try:
        vmem_cap = int(pltpu.get_tpu_info().vmem_capacity_bytes)
    except Exception:
        vmem_cap = 64 << 20   # conservative fallback (v7x per-TC VMEM)

    # Per-row VMEM footprint estimate:
    #   2 * V * itemsize  : double-buffered input block
    #   2 * V * 4         : f32 upcast + exp intermediates (worst case)
    #   1536              : lane-padded (TM,1) buffers (2x tgt dbl-buf i32 + acc f32)
    per_row_bytes = V * (2 * itemsize + 8) + 3 * 128 * 4

    if tile_rows is None:
        rows_by_vmem = max(row_align,
                           (vmem_cap - (16 << 20)) // max(1, per_row_bytes))
        rows_by_block = max(row_align,
                            x_block_budget_bytes // max(1, V * itemsize))
        rows = min(rows_by_vmem, rows_by_block)
    else:
        rows = max(row_align, tile_rows)
    rows = (rows // row_align) * row_align
    n_ceil = ((N + row_align - 1) // row_align) * row_align
    tile_rows = int(max(row_align, min(rows, n_ceil)))

    num_tiles = int(pl.cdiv(N, tile_rows))
    # Always split the row-tile stream 2 ways: both v7x TensorCores stay busy
    # (odd tile counts included); on 1-TC chips the parallel axis serializes and
    # the at-most-one duplicated (clamped) tile is fully masked in-kernel.
    num_cores = 2
    inner_tiles = int(pl.cdiv(num_tiles, num_cores))

    tgt2d = target.reshape(N, 1).astype(jnp.int32)

    vmem_limit = int(min(max(vmem_cap - (4 << 20), 1 << 20),
                         tile_rows * per_row_bytes + (8 << 20)))

    def in_map(c, i):
        # Clamp: the duplicated tile (odd num_tiles) is zeroed by the row mask.
        return (jnp.minimum(c * inner_tiles + i, num_tiles - 1), 0)

    kernel = functools.partial(_translation_loss_kernel, n_rows=N)

    out = pl.pallas_call(
        kernel,
        out_shape=jax.ShapeDtypeStruct((num_cores * 8, 128), jnp.float32),
        grid_spec=pltpu.PrefetchScalarGridSpec(
            num_scalar_prefetch=0,
            grid=(num_cores, inner_tiles),
            in_specs=[
                pl.BlockSpec((tile_rows, V), in_map),
                pl.BlockSpec((tile_rows, 1), in_map),
            ],
            out_specs=pl.BlockSpec((8, 128), lambda c, i: (c, 0)),
            scratch_shapes=[pltpu.VMEM((tile_rows, 1), jnp.float32)],
        ),
        compiler_params=pltpu.CompilerParams(
            dimension_semantics=("parallel", "arbitrary"),
            vmem_limit_bytes=vmem_limit,
        ),
    )(x, tgt2d)

    # One partial per core, replicated over its (8,128) output tile.
    return jnp.sum(out[0::8, 0])


def _reference_loss(x, target):
    """Plain-JAX reference mirroring the PyTorch module exactly."""
    logp = jax.nn.log_softmax(x.astype(jnp.float32), axis=-1)
    _, V = x.shape
    true_dist = jax.nn.one_hot(target, V, dtype=jnp.float32)
    true_dist = jnp.where((target == PAD_ID)[:, None], 0.0, true_dist)
    # KLDivLoss(sum): sum(t * (log(t) - logp)), with 0*log(0) = 0.
    safe_log_t = jnp.where(true_dist > 0, jnp.log(jnp.maximum(true_dist, 1e-30)), 0.0)
    return jnp.sum(true_dist * (safe_log_t - logp))


if __name__ == "__main__":
    key = jax.random.PRNGKey(0)

    # Case 1: small base case (16 tokens, vocab 32), some PAD rows, auto tile.
    kx, kt = jax.random.split(jax.random.fold_in(key, 0))
    N, V = 16, 32
    x = jax.random.normal(kx, (N, V), dtype=jnp.float32)
    tgt = jax.random.randint(kt, (N,), 0, V, dtype=jnp.int32)
    tgt = tgt.at[3].set(PAD_ID).at[7].set(PAD_ID)
    got = jax.block_until_ready(translation_loss(x, tgt))
    ref = jax.block_until_ready(_reference_loss(x, tgt))
    assert jnp.allclose(got, ref, rtol=1e-5, atol=1e-4), (got, ref)

    # Case 2: ragged row count, odd tile count (clamped duplicate tile path).
    kx, kt = jax.random.split(jax.random.fold_in(key, 1))
    N, V = 40, 160
    x = jax.random.normal(kx, (N, V), dtype=jnp.float32)
    tgt = jax.random.randint(kt, (N,), 0, V, dtype=jnp.int32)
    tgt = tgt.at[0].set(PAD_ID).at[21].set(PAD_ID)
    got = jax.block_until_ready(translation_loss(x, tgt, tile_rows=16))
    ref = jax.block_until_ready(_reference_loss(x, tgt))
    assert jnp.allclose(got, ref, rtol=1e-5, atol=1e-4), (got, ref)

    # Case 3: even tile count, bf16 logits on the wire (native-dtype max/gather).
    kx, kt = jax.random.split(jax.random.fold_in(key, 2))
    N, V = 64, 256
    x = jax.random.normal(kx, (N, V), dtype=jnp.float32).astype(jnp.bfloat16)
    tgt = jax.random.randint(kt, (N,), 0, V, dtype=jnp.int32)
    tgt = tgt.at[5].set(PAD_ID).at[33].set(PAD_ID)
    got = jax.block_until_ready(translation_loss(x, tgt, tile_rows=16))
    ref = jax.block_until_ready(_reference_loss(x, tgt))
    assert jnp.allclose(got, ref, rtol=1e-5, atol=1e-3), (got, ref)

    print("KERNEL_OK")
</pallas_src>

<mosaic_0001>
module attributes {stable_mosaic.version = 11 : i64} {
  func.func @_translation_loss_kernel(%arg0: i32, %arg1: i32, %arg2: memref<16x32xf32, #tpu.memory_space<vmem>>, %arg3: memref<16x1xi32, #tpu.memory_space<vmem>>, %arg4: memref<8x128xf32, #tpu.memory_space<vmem>>, %arg5: memref<16x1xf32, #tpu.memory_space<vmem>>) attributes {dimension_semantics = [#tpu.dimension_semantics<parallel>, #tpu.dimension_semantics<arbitrary>], iteration_bounds = array<i64: 2, 1>, scalar_prefetch = 0 : i64, scratch_operands = 1 : i64, tpu.core_type = #tpu.core_type<tc>, window_params = [{transform_indices = @transform_0, window_bounds = array<i64: 16, 32>}, {transform_indices = @transform_1, window_bounds = array<i64: 16, 1>}, {transform_indices = @transform_2, window_bounds = array<i64: 8, 128>}]} {
    %c0_i32 = arith.constant 0 : i32
    %0 = arith.cmpi eq, %arg1, %c0_i32 : i32
    %1 = arith.extui %0 : i1 to i32
    %c0_i32_0 = arith.constant 0 : i32
    %2 = arith.cmpi ne, %1, %c0_i32_0 : i32
    scf.if %2 {
      %cst_16 = arith.constant 0.000000e+00 : f32
      %42 = vector.broadcast %cst_16 : f32 to vector<16x1xf32>
      %c0_17 = arith.constant 0 : index
      %c0_18 = arith.constant 0 : index
      %43 = vector.load %arg5[%c0_17, %c0_18] : memref<16x1xf32, #tpu.memory_space<vmem>>, vector<16x1xf32>
      tpu.vector_store %arg5[%c0_17, %c0_18], %42 {strides = array<i32>} : memref<16x1xf32, #tpu.memory_space<vmem>>, vector<16x1xf32>,
    } else {
    }
    %c0 = arith.constant 0 : index
    %c0_1 = arith.constant 0 : index
    %3 = vector.load %arg2[%c0, %c0_1] : memref<16x32xf32, #tpu.memory_space<vmem>>, vector<16x32xf32>
    %c0_2 = arith.constant 0 : index
    %c0_3 = arith.constant 0 : index
    %4 = vector.load %arg3[%c0_2, %c0_3] : memref<16x1xi32, #tpu.memory_space<vmem>>, vector<16x1xi32>
    %cst = arith.constant dense<0xFF800000> : vector<16xf32>
    %5 = vector.multi_reduction <maximumf>, %3, %cst [1] : vector<16x32xf32> to vector<16xf32>
    %6 = vector.shape_cast %5 : vector<16xf32> to vector<16x1xf32>
    %7 = vector.broadcast %6 : vector<16x1xf32> to vector<16x32xf32>
    %8 = arith.subf %3, %7 : vector<16x32xf32>
    %9 = math.exp %8 : vector<16x32xf32>
    %cst_4 = arith.constant dense<0.000000e+00> : vector<16xf32>
    %10 = vector.multi_reduction <add>, %9, %cst_4 [1] : vector<16x32xf32> to vector<16xf32>
    %11 = vector.shape_cast %10 : vector<16xf32> to vector<16x1xf32>
    %12 = math.log %11 : vector<16x1xf32>
    %13 = tpu.iota {dimensions = array<i32: 1>} : vector<1x32xi32>
    %14 = vector.broadcast %13 : vector<1x32xi32> to vector<16x32xi32>
    %15 = vector.broadcast %4 : vector<16x1xi32> to vector<16x32xi32>
    %16 = arith.cmpi eq, %14, %15 : vector<16x32xi32>
    %cst_5 = arith.constant 0.000000e+00 : f32
    %17 = vector.broadcast %cst_5 : f32 to vector<16x32xf32>
    %18 = arith.select %16, %3, %17 : vector<16x32xi1>, vector<16x32xf32>
    %cst_6 = arith.constant dense<0.000000e+00> : vector<16xf32>
    %19 = vector.multi_reduction <add>, %18, %cst_6 [1] : vector<16x32xf32> to vector<16xf32>
    %20 = vector.shape_cast %19 : vector<16xf32> to vector<16x1xf32>
    %21 = arith.addf %6, %12 : vector<16x1xf32>
    %22 = arith.subf %21, %20 : vector<16x1xf32>
    %23 = tpu.iota {dimensions = array<i32: 0>} : vector<16x1xi32>
    %c1_i32 = arith.constant 1 : i32
    %24 = arith.muli %arg0, %c1_i32 : i32
    %25 = arith.addi %24, %arg1 : i32
    %c16_i32 = arith.constant 16 : i32
    %26 = arith.muli %25, %c16_i32 : i32
    %27 = vector.broadcast %26 : i32 to vector<16x1xi32>
    %28 = arith.addi %27, %23 : vector<16x1xi32>
    %c16_i32_7 = arith.constant 16 : i32
    %29 = vector.broadcast %c16_i32_7 : i32 to vector<16x1xi32>
    %30 = arith.cmpi slt, %28, %29 : vector<16x1xi32>
    %c1_i32_8 = arith.constant 1 : i32
    %31 = vector.broadcast %c1_i32_8 : i32 to vector<16x1xi32>
    %32 = arith.cmpi ne, %4, %31 : vector<16x1xi32>
    %33 = arith.andi %30, %32 : vector<16x1xi1>
    %c0_9 = arith.constant 0 : index
    %c0_10 = arith.constant 0 : index
    %34 = vector.load %arg5[%c0_9, %c0_10] : memref<16x1xf32, #tpu.memory_space<vmem>>, vector<16x1xf32>
    %cst_11 = arith.constant 0.000000e+00 : f32
    %35 = vector.broadcast %cst_11 : f32 to vector<16x1xf32>
    %36 = arith.select %33, %22, %35 : vector<16x1xi1>, vector<16x1xf32>
    %37 = arith.addf %34, %36 : vector<16x1xf32>
    %c0_12 = arith.constant 0 : index
    %c0_13 = arith.constant 0 : index
    %38 = vector.load %arg5[%c0_12, %c0_13] : memref<16x1xf32, #tpu.memory_space<vmem>>, vector<16x1xf32>
    tpu.vector_store %arg5[%c0_12, %c0_13], %37 {strides = array<i32>} : memref<16x1xf32, #tpu.memory_space<vmem>>, vector<16x1xf32>,
    %c0_i32_14 = arith.constant 0 : i32
    %39 = arith.cmpi eq, %arg1, %c0_i32_14 : i32
    %40 = arith.extui %39 : i1 to i32
    %c0_i32_15 = arith.constant 0 : i32
    %41 = arith.cmpi ne, %40, %c0_i32_15 : i32
    scf.if %41 {
      %c0_16 = arith.constant 0 : index
      %c0_17 = arith.constant 0 : index
      %42 = vector.load %arg5[%c0_16, %c0_17] : memref<16x1xf32, #tpu.memory_space<vmem>>, vector<16x1xf32>
      %43 = vector.shape_cast %42 : vector<16x1xf32> to vector<1x16x1xf32>
      %cst_18 = arith.constant dense<0.000000e+00> : vector<1xf32>
      %44 = vector.multi_reduction <add>, %43, %cst_18 [1, 2] : vector<1x16x1xf32> to vector<1xf32>
      %45 = vector.shape_cast %44 : vector<1xf32> to vector<1x1x1xf32>
      %46 = vector.extract %45[0, 0, 0] : f32 from vector<1x1x1xf32>
      %47 = vector.broadcast %46 : f32 to vector<8x128xf32>
      %c0_19 = arith.constant 0 : index
      %c0_20 = arith.constant 0 : index
      %48 = vector.load %arg4[%c0_19, %c0_20] : memref<8x128xf32, #tpu.memory_space<vmem>>, vector<8x128xf32>
      tpu.vector_store %arg4[%c0_19, %c0_20], %47 {strides = array<i32>} : memref<8x128xf32, #tpu.memory_space<vmem>>, vector<8x128xf32>,
    } else {
    }
    return
  }
  func.func @transform_0(%arg0: i32, %arg1: i32) -> (i32, i32) {
    %c1_i32 = arith.constant 1 : i32
    %0 = arith.muli %arg0, %c1_i32 : i32
    %1 = arith.addi %0, %arg1 : i32
    %c0_i32 = arith.constant 0 : i32
    %2 = arith.minsi %1, %c0_i32 : i32
    %c0_i32_0 = arith.constant 0 : i32
    %c0_i32_1 = arith.constant 0 : i32
    return %2, %c0_i32_0 : i32, i32
  }
  func.func @transform_1(%arg0: i32, %arg1: i32) -> (i32, i32) {
    %c1_i32 = arith.constant 1 : i32
    %0 = arith.muli %arg0, %c1_i32 : i32
    %1 = arith.addi %0, %arg1 : i32
    %c0_i32 = arith.constant 0 : i32
    %2 = arith.minsi %1, %c0_i32 : i32
    %c0_i32_0 = arith.constant 0 : i32
    %c0_i32_1 = arith.constant 0 : i32
    return %2, %c0_i32_0 : i32, i32
  }
  func.func @transform_2(%arg0: i32, %arg1: i32) -> (i32, i32) {
    %c0_i32 = arith.constant 0 : i32
    %c0_i32_0 = arith.constant 0 : i32
    return %arg0, %c0_i32 : i32, i32
  }
}

</mosaic_0001>

<bundles_post_ra>
// kernel: tpu_custom_call.1
= control target key start
LH: loop header
LB: loop body
LE: loop exit
PB: predicated region body
PF: predicated region fallthrough
CT: control target
= control target key end

     0   :  { %7 = vsyncpa [#allocation4], 0  ;;  %s707_s0 = inlined_call_operand.vmem [shape: f32[16,32], index: 0, kind: input, shape index: {}]   ;;  %s708_s1 = inlined_call_operand.vmem [shape: s32[16,1], index: 1, kind: input, shape index: {}]   ;;  %s709_s2 = inlined_call_operand.hbm [shape: f32[16,128], index: 2, kind: output, shape index: {}]  }
   0x1   :  { %9 = vsyncpa [#allocation4 + $0x1], 0  ;;  %s594_s9 = smov 0   ;;  %s596_s10 = smov 0  }
   0x2   :  { %s598_s11 = smov 0   ;;  %s600_s12 = smov 0  }
   0x3   :  { %s602_s13 = smov 0   ;;  %s604_s14 = smov 0  }
   0x4 LB: > { %s413_s15 = sadd.s32 4294967295, %s575_s14   ;;  %s414_s16 = sadd.s32 4294967294, %s575_s14   ;;  %s575_s14 = sphi %s604_s14, %s15_s14   ;;  %s571_s13 = sphi %s602_s13, %s716_s13   ;;  %s567_s12 = sphi %s600_s12, %s715_s12   ;;  %s563_s11 = sphi %s598_s11, %s714_s11   ;;  %s559_s10 = sphi %s596_s10, %s713_s10   ;;  %s555_s9 = sphi %s594_s9, %s712_s9  }
   0x5   : > { %s27_s17 = sadd.s32 1, %s571_s13  ;;  %s98_s18 = sadd.s32 1, %s563_s11 }
   0x6   : > { %p29_p0 = scmp.ge.s32.totalorder %s27_s17, 2  ;;  %p108_p1 = scmp.ne.s32.totalorder %s563_s11, %s559_s10 }
   0x7   : > { %p109_p2 = scmp.eq.s32.totalorder %s413_s15, 1  ;;  %p114_p3 = scmp.ne.s32.totalorder %s559_s10, %s555_s9 }
   0x8   : > { %s718_s17 = smov (%p29_p0, %s27_s17), 0  ;;  %p115_p5 = scmp.eq.s32.totalorder %s414_s16, 1 }
   0x9   : > { %p634_p4 = por %p109_p2, %p108_p1  ;;  %s95_s20 = ssub.s32 %s571_s13, %s718_s17 }
   0xa   : > { %p417_p6 = scmp.ge.s32.totalorder %s575_s14, 1  ;;  %p96_p7 = scmp.eq.s32.totalorder %s95_s20, 0 }
   0xb   : > { %p641_p8 = por %p115_p5, %p114_p3  ;;  %p163_p9 = scmp.lt.s32.totalorder %s575_s14, 3 }
   0xc   : > { %s647_s22 = scalar_select %p96_p7, %s563_s11, %s98_s18  }
   0xd   : > { %p164_p10 = pnand %p417_p6, %p163_p9 }
   0xe   : > { %p197_p11 = scmp.lt.s32.totalorder (!%p164_p10), %s567_s12, 0  ;;  %s423_s4 = sshll.u32 (!%p164_p10), %s567_s12, 4 }
   0xf   : > { %167 = sbr.rel (%p164_p10) target bundleno = 491 (0x1eb), region = 28  ;;  %s193_s5 = sand.u32 (!%p164_p10), 1, %s559_s10  }
  0x10   : > { %s418_s6 = sshll.u32 (!%p164_p10), %s193_s5, 3  ;;  %s425_s7 = sshll.u32 (!%p164_p10), %s567_s12, 3 }
  0x11   : > { %s329_s16 = scalar_lea.hbm (!%p164_p10), %s709_s2, %s425_s7  ;;  %s195_s18 = scalar_lea.vmem (!%p164_p10), [#allocation3], %s418_s6 }
  0x12   : > { %s331_s20 = sshll.u32 (!%p164_p10), %s195_s18, 4  ;;  %s517_s29 = scalar_lea.hbm (!%p164_p10), %s709_s2, 16  ;;  %s332_s20 = int_to_ptr.vmem [resolvable:$true] %s331_s20 }
  0x14   : > { %v577_v0 = vmov 0   ;;  %s198_s23 = scalar_select %p197_p11, %s567_s12, 0  ;;  %vm231_vm0 = vcmask 261120   ;;  %v254_v7 = vlaneseq  ;;  %vm224_vm3 = vcmask 7168  }
  0x15   : > { %487 = vset.pattern.permute.xlu1 %v577_v0  ;;  %488 = vset.pattern.permute.xlu0 %v577_v0  ;;  %v578_v25 = vmov 0.0   ;;  %v281_v28 = vstv %s423_s4 }
  0x16   : > { %s419_s24 = sshll.u32 %s198_s23, 1  ;;  %v255_v8 = vand.u32 127, %v254_v7  ;;  %226 = vst.msk [vmem:[#allocation2 + $0x8] sm:$0xff] %vm224_vm3, %v578_v25  ;;  %v277_v26 = vshrl.u32 %v254_v7, 7  ;;  %s333_s23 = sshll.u32 %s329_s16, 4  ;;  %s334_s23 = int_to_ptr.hbm [resolvable:$true] %s333_s23 }
  0x17   : > { %p200_p12 = scmp.lt.s32.totalorder %s419_s24, 1  ;;  %225 = vst.msk [vmem:[#allocation2] sm:$0xff] %vm224_vm3, %v578_v25  ;;  %s511_s26 = sshra.s32 %s334_s23, 4  ;;  %s512_s26 = int_to_ptr.hbm [resolvable:$true] %s511_s26 }
  0x18   : > { %v282_v29 = vadd.s32 %v281_v28, %v277_v26  ;;  %v278_v33 = vadd.s32 8, %v277_v26  ;;  %s513_s27 = scalar_lea.hbm %s512_s26, 8  ;;  %p518_p2 = scmp.lt.s32.totalorder %s512_s26, %s709_s2 }
  0x19   : > { %s720_s24 = smov (!%p200_p12, %s419_s24), 1  ;;  %p514_p13 = scmp.ne.s32.totalorder %s512_s26, %s513_s27 }
  0x1a   : > { %s420_s25 = sshll.u32 %s720_s24, 3  ;;  %vm284_vm4 = vcmp.lt.s32.totalorder %v282_v29, 16  ;;  %v283_v36 = vadd.s32 %v281_v28, %v278_v33  ;;  %p519_p3 = scmp.lt.s32.totalorder %s517_s29, %s513_s27 }
  0x1b   : > { %s203_s28 = scalar_lea.vmem %s707_s0, %s420_s25  ;;  %s215_s3 = scalar_lea.vmem %s708_s1, %s420_s25 }
  0x1c   : > { %v227_v1 = vld [vmem:[%s203_s28] sm:$0xff]  ;;  %v228_v4 = vld [vmem:[%s203_s28 + $0x8] sm:$0xff]  ;;  %vm285_vm8 = vcmp.lt.s32.totalorder %v283_v36, 16  ;;  %s319_s25 = scalar_lea.sflag [#allocation4], %s193_s5  ;;  %p515_p0 = pnand %p514_p13, %p634_p4 }
  0x1d   : > { %v229_v2 = vld [vmem:[%s215_s3] sm:$0xff]  ;;  %v232_v3 = vsel %vm231_vm0, %v227_v1, -inf  ;;  %v230_v5 = vld [vmem:[%s215_s3 + $0x8] sm:$0xff]  ;;  %v235_v6 = vsel %vm231_vm0, %v228_v4, -inf  ;;  %p520_p5 = por %p519_p3, %p518_p2 }
  0x1e   : > { %257 = vperm.xlu1 %487, %v229_v2   ;;  %233 = vmax.xlane.f32.xlu0 %v232_v3  ;;  %vm286_vm5 = vcmp.ne.s32.totalorder %v229_v2, 1  ;;  %v290_v37 = vld [vmem:[#allocation2] sm:$0xff]  ;;  %vm287_vm7 = vcmp.ne.s32.totalorder %v230_v5, 1  ;;  %v291_v45 = vld [vmem:[#allocation2 + $0x8] sm:$0xff]  ;;  %p516_p1 = pneg %p515_p0 }
  0x1f   : > { %vm288_vm6 = vmand %vm284_vm4, %vm286_vm5 }
  0x20   : > { %vm289_vm9 = vmand %vm285_vm8, %vm287_vm7  ;;  %p521_p6 = pnand %p520_p5, %p516_p1 }
  0x26   : > { %260 = vperm.xlu1 %487, %v230_v5   ;;  %236 = vmax.xlane.f32.xlu0 %v235_v6 }
  0x90   : > { %v258_v9 = vpop.permute.xlu1 %257 }
  0x91   : > { %vm262_vm1 = vcmp.eq.s32.totalorder %v255_v8, %v258_v9  ;;  %v234_v10 = vpop.xlane.xlu0 %233 }
  0x92   : > { %v264_v11 = vsel %vm262_vm1, %v227_v1, 0.0  ;;  %v238_v12 = vsub.f32 %v227_v1, %v234_v10 }
  0x93   : > { %v266_v13 = vsel %vm231_vm0, %v264_v11, 0.0 }
  0x94   : > { %267 = vadd.xlane.f32.xlu0 %v266_v13  ;;  %v240_v14 = vmul.f32 1.442695, %v238_v12 }
  0x96   : > { %489 = vpow2.f32 %v240_v14 }
  0x98   : > { %v261_v15 = vpop.permute.xlu1 %260 }
  0x99   : > { %vm263_vm2 = vcmp.eq.s32.totalorder %v255_v8, %v261_v15  ;;  %v237_v16 = vpop.xlane.xlu0 %236 }
  0x9a   : > { %v265_v17 = vsel %vm263_vm2, %v228_v4, 0.0  ;;  %v239_v18 = vsub.f32 %v228_v4, %v237_v16 }
  0x9b   : > { %v269_v19 = vsel %vm231_vm0, %v265_v17, 0.0 }
  0x9c   : > { %270 = vadd.xlane.f32.xlu1 %v269_v19  ;;  %v490_v20 = vpop.eup %489  ;;  %v242_v21 = vmul.f32 1.442695, %v239_v18 }
  0x9d   : > { %v244_v22 = vsel %vm231_vm0, %v490_v20, 0.0 }
  0x9e   : > { %491 = vpow2.f32 %v242_v21  ;;  %245 = vadd.xlane.f32.xlu2 %v244_v22 }
  0xa4   : > { %v492_v23 = vpop.eup %491 }
  0xa5   : > { %v247_v24 = vsel %vm231_vm0, %v492_v23, 0.0 }
  0xa6   : > { %248 = vadd.xlane.f32.xlu2 %v247_v24 }
 0x107   : > { %v268_v34 = vpop.xlane.xlu0 %267 }
 0x10f   : > { %v271_v44 = vpop.xlane.xlu1 %270 }
 0x111   : > { %v246_v27 = vpop.xlane.xlu2 %245 }
 0x112   : > { %493 = vlog2.f32 %v246_v27 }
 0x118   : > { %v494_v30 = vpop.eup %493 }
 0x119   : > { %v251_v31 = vmul.f32 0.6931472, %v494_v30  ;;  %v249_v32 = vpop.xlane.xlu2 %248 }
 0x11a   : > { %495 = vlog2.f32 %v249_v32 }
 0x11b   : > { %v272_v35 = vadd.f32 %v251_v31, %v234_v10 }
 0x11d   : > { %v274_v38 = vsub.f32 %v272_v35, %v268_v34 }
 0x11f   : > { %v292_v39 = vsel %vm288_vm6, %v274_v38, 0.0 }
 0x120   : > { %v496_v40 = vpop.eup %495  ;;  %v294_v41 = vadd.f32 %v292_v39, %v290_v37 }
 0x121   : > { %v253_v42 = vmul.f32 0.6931472, %v496_v40 }
 0x122   : > { %297 = vst.msk [vmem:[#allocation2] sm:$0xff] %vm224_vm3, %v294_v41 }
 0x123   : > { %v273_v43 = vadd.f32 %v253_v42, %v237_v16 }
 0x125   : > { %v275_v46 = vsub.f32 %v273_v43, %v271_v44 }
 0x127   : > { %v293_v47 = vsel %vm289_vm9, %v275_v46, 0.0 }
 0x128   : > { %v295_v48 = vadd.f32 %v293_v47, %v291_v45 }
 0x129   : > { %v302_v49 = vld [vmem:[#allocation2] sm:$0xff] }
 0x12a   : > { %298 = vst.msk [vmem:[#allocation2 + $0x8] sm:$0xff] %vm224_vm3, %v295_v48  ;;  %v304_v51 = vsel %vm224_vm3, %v302_v49, 0.0 }
 0x131   : > { %v303_v50 = vld [vmem:[#allocation2 + $0x8] sm:$0xff] }
 0x132   : > { %v305_v52 = vsel %vm224_vm3, %v303_v50, 0.0 }
 0x133   : > { %v306_v53 = vadd.f32 %v305_v52, %v304_v51 }
 0x135   : > { %307 = vadd.xlane.f32.xlu2 %v306_v53 }
 0x1a8   : > { %v308_v54 = vpop.xlane.xlu2 %307 }
 0x1a9   : > { %v309_v55 = vrot.slane %v308_v54, 4 }
 0x1ab   : > { %v310_v56 = vadd.f32 %v309_v55, %v308_v54 }
 0x1ad   : > { %v311_v57 = vrot.slane %v310_v56, 2 }
 0x1af   : > { %v312_v58 = vadd.f32 %v311_v57, %v310_v56 }
 0x1b1   : > { %v313_v59 = vrot.slane %v312_v58, 1 }
 0x1b3   : > { %v314_v60 = vadd.f32 %v313_v59, %v312_v58 }
 0x1b5   : > { %428 = vpush %v314_v60 }
 0x1e6   : > { %s429_s24 = spop %428 }
 0x1e7   : > { %v316_v61 = vstv %s429_s24 }
 0x1e8   : > { %317 = vst [vmem:[%s195_s18] sm:$0xff] %v316_v61 }
 0x1e9   : > { %524 = shalt.err (!%p521_p6)
}
 0x1ea   : > { %430 = dma.vmem_to_hbm [thread:$0]  (%p634_p4), %s332_s20, 128, %s334_s23, %s319_s25  }
 0x1eb PF: > { %p436_p7 = scmp.ge.s32.totalorder %s575_s14, 2  ;;  %s345_s4 = sand.u32 1, %s555_s9  }
 0x1ec   : > { %s346_s5 = scalar_lea.sflag [#allocation4], %s345_s4 }
 0x1ed   : > { %p433_p9 = pnand %p436_p7, %p641_p8 }
 0x1ef   : > { %p434_p10 = pneg %p433_p9 }
 0x1f1   : > { %550 = dma.done.wait (%p434_p10), %s346_s5, 128  }
 0x1f2   : > { %552 = vsyncadd (%p434_p10), %s346_s5, 4294967168  ;;  %s15_s14 = sadd.s32 1, %s575_s14   ;;  %s712_s9 = smov %s559_s10 }
 0x1f3   : > { %p12_p11 = scmp.ge.s32.totalorder %s15_s14, 4   ;;  %s713_s10 = smov %s563_s11 }
 0x1f4   : > { %s714_s11 = smov %s647_s22  ;;  %s715_s12 = smov %s571_s13 }
 0x1f5   : > { %s716_s13 = smov %s718_s17  ;;  %14 = sbr.rel (!%p12_p11) target bundleno = 4 (0x4), region = 74 }
 0x1fa   :  { %352 = vsyncpa [#allocation4], 1 }
 0x1fb   :  { %354 = vsyncpa [#allocation4 + $0x1], 1 }

</bundles_post_ra>
